<compile_context>
chip_gen: v7x
topology: tpu7x:2x2x1
jax: 0.10.0
libtpu: 0.0.40
codegen_flags: <defaults>
</compile_context>

<pallas_src>
import math

import jax
import jax.numpy as jnp
from jax import lax
from jax.experimental import pallas as pl
from jax.experimental.pallas import tpu as pltpu


_MIB = 1024 * 1024


# ---------------------------------------------------------------------------
# helpers
# ---------------------------------------------------------------------------
def _pick_tile(n: int, max_tile: int, mult: int) -> int:
    """Largest t <= max_tile with n % t == 0 and t % mult == 0; else n (full)."""
    if n <= max_tile:
        return n
    start = max_tile - (max_tile % mult)
    for t in range(start, mult - 1, -mult):
        if n % t == 0:
            return t
    return n


def _padded_bytes(shape, dtype) -> int:
    """VMEM footprint of one buffer, padded to (sublane, 128-lane) tiles."""
    itemsize = jnp.dtype(dtype).itemsize
    dims = list(shape)
    if dims:
        dims[-1] = -(-dims[-1] // 128) * 128
    if len(dims) >= 2:
        sub = 8 * max(1, 4 // itemsize)      # f32: 8, bf16: 16, int8: 32
        dims[-2] = -(-dims[-2] // sub) * sub
    n = itemsize
    for d in dims:
        n *= d
    return n


def _vmem_limit(est_bytes: int) -> int:
    # 1.5x safety factor; floor at the common default, cap so it fits v7x.
    return int(min(max(int(1.5 * est_bytes), 32 * _MIB), 64 * _MIB))


# ---------------------------------------------------------------------------
# generic tiled linear kernel:  y = x @ W^T + b   (full-width MXU matmuls)
# ---------------------------------------------------------------------------
def _linear_kernel(x_ref, wt_ref, b_ref, o_ref):
    # x: (1, TS, D) bf16 ; wt: (D, TN) bf16 ; b: (1, TN) f32 ; o: (1, TS, TN)
    y = jnp.dot(x_ref[0], wt_ref[...], preferred_element_type=jnp.float32)
    o_ref[0] = (y + b_ref[...]).astype(o_ref.dtype)


def _linear(x, w_t, bias, out_dtype):
    """x: (B, S, D) bf16; w_t: (D, Dout) bf16 (already transposed); bias: (1, Dout) f32."""
    B, S, D = x.shape
    Dout = w_t.shape[1]
    TS = _pick_tile(S, 256, 8)
    TN = _pick_tile(Dout, 1024, 128)
    grid = (B, S // TS, Dout // TN)

    est = (2 * (_padded_bytes((TS, D), x.dtype)
                + _padded_bytes((D, TN), w_t.dtype)
                + _padded_bytes((1, TN), bias.dtype)
                + _padded_bytes((TS, TN), out_dtype))
           + 2 * _padded_bytes((TS, TN), jnp.float32))

    cost = pl.CostEstimate(
        flops=int(2 * B * S * D * Dout),
        transcendentals=0,
        bytes_accessed=int(B * S * D * jnp.dtype(x.dtype).itemsize
                           + D * Dout * jnp.dtype(w_t.dtype).itemsize
                           + B * S * Dout * jnp.dtype(out_dtype).itemsize))

    return pl.pallas_call(
        _linear_kernel,
        out_shape=jax.ShapeDtypeStruct((B, S, Dout), out_dtype),
        grid_spec=pltpu.PrefetchScalarGridSpec(
            num_scalar_prefetch=0,
            grid=grid,
            in_specs=[
                pl.BlockSpec((1, TS, D), lambda b, si, ni: (b, si, 0)),
                pl.BlockSpec((D, TN), lambda b, si, ni: (0, ni)),
                pl.BlockSpec((1, TN), lambda b, si, ni: (0, ni)),
            ],
            out_specs=pl.BlockSpec((1, TS, TN), lambda b, si, ni: (b, si, ni)),
        ),
        compiler_params=pltpu.CompilerParams(
            dimension_semantics=("parallel", "parallel", "parallel"),
            vmem_limit_bytes=_vmem_limit(est)),
        cost_estimate=cost,
    )(x, w_t, bias)


# ---------------------------------------------------------------------------
# flash-style attention kernel (per-head, online softmax over kv tiles)
# ---------------------------------------------------------------------------
def _flash_kernel(q_ref, k_ref, v_ref, o_ref, m_sc, l_sc, acc_sc):
    kv = pl.program_id(3)

    @pl.when(kv == 0)
    def _():
        m_sc[...] = jnp.full(m_sc.shape, -jnp.inf, dtype=jnp.float32)
        l_sc[...] = jnp.zeros(l_sc.shape, dtype=jnp.float32)
        acc_sc[...] = jnp.zeros(acc_sc.shape, dtype=jnp.float32)

    q = q_ref[0, 0]            # (TQ, dh) bf16 (1/sqrt(dh) folded into Wq/bq)
    k = k_ref[0, 0]            # (TK, dh) bf16
    v = v_ref[0, 0]            # (TK, dh) bf16

    # scores = q @ k.T without materializing a transpose.
    s = lax.dot_general(q, k, dimension_numbers=(((1,), (1,)), ((), ())),
                        preferred_element_type=jnp.float32)        # (TQ, TK) f32

    m_prev = m_sc[...]
    m_new = jnp.maximum(m_prev, jnp.max(s, axis=-1, keepdims=True))
    alpha = jnp.exp(m_prev - m_new)
    p = jnp.exp(s - m_new)
    l_sc[...] = alpha * l_sc[...] + jnp.sum(p, axis=-1, keepdims=True)
    acc_sc[...] = alpha * acc_sc[...] + jnp.dot(
        p.astype(jnp.bfloat16), v, preferred_element_type=jnp.float32)
    m_sc[...] = m_new

    @pl.when(kv == pl.num_programs(3) - 1)
    def _():
        # Approximate reciprocal on the EUP (flagged: inference-quality only).
        inv_l = pl.reciprocal(l_sc[...], approx=True)
        o_ref[0, 0] = (acc_sc[...] * inv_l).astype(o_ref.dtype)


def _flash_attention(q, k, v):
    """q: (B, H, Sq, dh) bf16 (pre-scaled); k, v: (B, H, Sk, dh) bf16."""
    B, H, Sq, dh = q.shape
    Sk = k.shape[2]
    TQ = _pick_tile(Sq, 256, 8)
    TK = _pick_tile(Sk, 512, 8)
    grid = (B, H, Sq // TQ, Sk // TK)

    est = (2 * (_padded_bytes((TQ, dh), jnp.bfloat16)          # q (double-buffered)
                + 2 * _padded_bytes((TK, dh), jnp.bfloat16)    # k, v
                + _padded_bytes((TQ, dh), jnp.bfloat16))       # out
           + 2 * _padded_bytes((TQ, 1), jnp.float32)           # m, l scratch
           + _padded_bytes((TQ, dh), jnp.float32)              # acc scratch
           + 4 * _padded_bytes((TQ, TK), jnp.float32))         # live temporaries

    cost = pl.CostEstimate(
        flops=int(4 * B * H * Sq * Sk * dh),
        transcendentals=int(B * H * Sq * Sk),
        bytes_accessed=int(2 * (B * H * Sq * dh                       # q read
                                + 2 * B * H * (Sq // TQ) * Sk * dh    # k+v re-read per q tile
                                + B * H * Sq * dh)))                  # ctx write

    return pl.pallas_call(
        _flash_kernel,
        out_shape=jax.ShapeDtypeStruct((B, H, Sq, dh), jnp.bfloat16),
        grid_spec=pltpu.PrefetchScalarGridSpec(
            num_scalar_prefetch=0,
            grid=grid,
            in_specs=[
                pl.BlockSpec((1, 1, TQ, dh), lambda b, h, qi, kv: (b, h, qi, 0)),
                pl.BlockSpec((1, 1, TK, dh), lambda b, h, qi, kv: (b, h, kv, 0)),
                pl.BlockSpec((1, 1, TK, dh), lambda b, h, qi, kv: (b, h, kv, 0)),
            ],
            out_specs=pl.BlockSpec((1, 1, TQ, dh),
                                   lambda b, h, qi, kv: (b, h, qi, 0)),
            scratch_shapes=[
                pltpu.VMEM((TQ, 1), jnp.float32),    # running max m
                pltpu.VMEM((TQ, 1), jnp.float32),    # running denom l
                pltpu.VMEM((TQ, dh), jnp.float32),   # running context acc
            ],
        ),
        compiler_params=pltpu.CompilerParams(
            dimension_semantics=("parallel", "parallel", "parallel", "arbitrary"),
            vmem_limit_bytes=_vmem_limit(est)),
        cost_estimate=cost,
    )(q, k, v)


# ---------------------------------------------------------------------------
# full MultiHeadAttention forward
# ---------------------------------------------------------------------------
def multi_head_attention(query, key, value, params, *, n_heads: int):
    """query: (B, Sq, D); key/value: (B, Sk, D); returns (B, Sq, D) in query.dtype."""
    B, Sq, D = query.shape
    Sk = key.shape[1]
    d_head = D // n_heads
    assert d_head * n_heads == D, "d_model must be divisible by n_heads"

    wq, bq, wk, bk, wv, bv, wo, bo = params
    inv_sqrt_dh = 1.0 / math.sqrt(d_head)

    # Host-side weight prep: nn.Linear weight (out, in) -> transposed (in, out),
    # bf16; 1/sqrt(d_head) folded into the query projection.
    wq_t = (wq * inv_sqrt_dh).T.astype(jnp.bfloat16)
    wk_t = wk.T.astype(jnp.bfloat16)
    wv_t = wv.T.astype(jnp.bfloat16)
    wo_t = wo.T.astype(jnp.bfloat16)
    bq_s = (bq * inv_sqrt_dh).reshape(1, D).astype(jnp.float32)
    bk_s = bk.reshape(1, D).astype(jnp.float32)
    bv_s = bv.reshape(1, D).astype(jnp.float32)
    bo_s = bo.reshape(1, D).astype(jnp.float32)

    qb = query.astype(jnp.bfloat16)
    kb = key.astype(jnp.bfloat16)
    vb = value.astype(jnp.bfloat16)

    # Projections, each computed exactly once (full-width MXU matmuls).
    qp = _linear(qb, wq_t, bq_s, jnp.bfloat16)          # (B, Sq, D), pre-scaled
    kp = _linear(kb, wk_t, bk_s, jnp.bfloat16)          # (B, Sk, D)
    vp = _linear(vb, wv_t, bv_s, jnp.bfloat16)          # (B, Sk, D)

    # Split into heads (layout plumbing only, outside the kernels).
    def split(x, s):
        return x.reshape(B, s, n_heads, d_head).transpose(0, 2, 1, 3)

    ctx = _flash_attention(split(qp, Sq), split(kp, Sk), split(vp, Sk))

    # Merge heads, then one full-width output projection.
    ctx = ctx.transpose(0, 2, 1, 3).reshape(B, Sq, D)
    return _linear(ctx, wo_t, bo_s, query.dtype)


# ---------------------------------------------------------------------------
# plain-JAX f32 reference (mirrors the PyTorch forward, eval mode)
# ---------------------------------------------------------------------------
def _reference(query, key, value, params, *, n_heads: int):
    wq, bq, wk, bk, wv, bv, wo, bo = params
    B, Sq, D = query.shape
    d_head = D // n_heads

    def lin(x, w, b):
        return jnp.einsum('bsd,ed->bse', x, w) + b

    qe, ke, ve = lin(query, wq, bq), lin(key, wk, bk), lin(value, wv, bv)

    def split(x):
        Bx, Sx, _ = x.shape
        return x.reshape(Bx, Sx, n_heads, d_head).transpose(0, 2, 1, 3)

    qh, kh, vh = split(qe), split(ke), split(ve)
    scores = jnp.einsum('bhqe,bhke->bhqk', qh, kh) / math.sqrt(d_head)
    p = jax.nn.softmax(scores, axis=-1)
    out = jnp.einsum('bhqk,bhke->bhqe', p, vh)
    out = out.transpose(0, 2, 1, 3).reshape(B, Sq, D)
    return jnp.einsum('bsd,ed->bse', out, wo) + bo


if __name__ == "__main__":
    B, S, d_model, n_heads = 2, 8, 32, 4

    key0 = jax.random.PRNGKey(0)
    ks = jax.random.split(key0, 12)

    scale = 0.05
    wq = scale * jax.random.normal(ks[0], (d_model, d_model), jnp.float32)
    bq = scale * jax.random.normal(ks[1], (d_model,), jnp.float32)
    wk = scale * jax.random.normal(ks[2], (d_model, d_model), jnp.float32)
    bk = scale * jax.random.normal(ks[3], (d_model,), jnp.float32)
    wv = scale * jax.random.normal(ks[4], (d_model, d_model), jnp.float32)
    bv = scale * jax.random.normal(ks[5], (d_model,), jnp.float32)
    wo = scale * jax.random.normal(ks[6], (d_model, d_model), jnp.float32)
    bo = scale * jax.random.normal(ks[7], (d_model,), jnp.float32)
    params = (wq, bq, wk, bk, wv, bv, wo, bo)

    query = jax.random.normal(ks[8], (B, S, d_model), jnp.float32)
    key_in = jax.random.normal(ks[9], (B, S, d_model), jnp.float32)
    value = jax.random.normal(ks[10], (B, S, d_model), jnp.float32)

    out = multi_head_attention(query, key_in, value, params, n_heads=n_heads)
    out = jax.block_until_ready(out)

    ref = _reference(query, key_in, value, params, n_heads=n_heads)
    assert out.shape == (B, S, d_model)
    # bf16 MXU matmuls + bf16 HBM intermediates (f32 accumulation, f32 softmax).
    assert jnp.allclose(out, ref, atol=2e-2, rtol=2e-2), "mismatch vs reference"

    print("KERNEL_OK")
</pallas_src>

<mosaic_0001>
module attributes {stable_mosaic.version = 11 : i64} {
  func.func @_linear_kernel(%arg0: i32, %arg1: i32, %arg2: i32, %arg3: memref<1x8x32xbf16, #tpu.memory_space<vmem>>, %arg4: memref<32x32xbf16, #tpu.memory_space<vmem>>, %arg5: memref<1x32xf32, #tpu.memory_space<vmem>>, %arg6: memref<1x8x32xbf16, #tpu.memory_space<vmem>>) attributes {dimension_semantics = [#tpu.dimension_semantics<parallel>, #tpu.dimension_semantics<parallel>, #tpu.dimension_semantics<parallel>], iteration_bounds = array<i64: 2, 1, 1>, scalar_prefetch = 0 : i64, scratch_operands = 0 : i64, tpu.core_type = #tpu.core_type<tc>, window_params = [{transform_indices = @transform_0, window_bounds = array<i64: 1, 8, 32>}, {transform_indices = @transform_1, window_bounds = array<i64: 32, 32>}, {transform_indices = @transform_2, window_bounds = array<i64: 1, 32>}, {transform_indices = @transform_3, window_bounds = array<i64: 1, 8, 32>}]} {
    %c0 = arith.constant 0 : index
    %c0_0 = arith.constant 0 : index
    %c0_1 = arith.constant 0 : index
    %0 = vector.load %arg3[%c0, %c0_0, %c0_1] : memref<1x8x32xbf16, #tpu.memory_space<vmem>>, vector<1x8x32xbf16>
    %1 = vector.shape_cast %0 : vector<1x8x32xbf16> to vector<8x32xbf16>
    %c0_2 = arith.constant 0 : index
    %c0_3 = arith.constant 0 : index
    %2 = vector.load %arg4[%c0_2, %c0_3] : memref<32x32xbf16, #tpu.memory_space<vmem>>, vector<32x32xbf16>
    %cst = arith.constant dense<0.000000e+00> : vector<8x32xf32>
    %3 = tpu.matmul %1, %2, %cst {dimension_numbers = #tpu.dot_dimension_numbers<[1], [0], [0], [1], [0, 0, 1, 1], [], []>} : vector<8x32xbf16>, vector<32x32xbf16>, vector<8x32xf32> -> vector<8x32xf32>
    %c0_4 = arith.constant 0 : index
    %c0_5 = arith.constant 0 : index
    %4 = vector.load %arg5[%c0_4, %c0_5] : memref<1x32xf32, #tpu.memory_space<vmem>>, vector<1x32xf32>
    %5 = vector.broadcast %4 : vector<1x32xf32> to vector<8x32xf32>
    %6 = arith.addf %3, %5 : vector<8x32xf32>
    %7 = arith.truncf %6 : vector<8x32xf32> to vector<8x32xbf16>
    %c0_6 = arith.constant 0 : index
    %c0_7 = arith.constant 0 : index
    %c0_8 = arith.constant 0 : index
    %8 = vector.load %arg6[%c0_6, %c0_7, %c0_8] : memref<1x8x32xbf16, #tpu.memory_space<vmem>>, vector<1x8x32xbf16>
    %9 = vector.shape_cast %8 : vector<1x8x32xbf16> to vector<8x32xbf16>
    %10 = vector.shape_cast %7 : vector<8x32xbf16> to vector<1x8x32xbf16>
    tpu.vector_store %arg6[%c0_6, %c0_7, %c0_8], %10 {strides = array<i32>} : memref<1x8x32xbf16, #tpu.memory_space<vmem>>, vector<1x8x32xbf16>,
    return
  }
  func.func @transform_0(%arg0: i32, %arg1: i32, %arg2: i32) -> (i32, i32, i32) {
    %c0_i32 = arith.constant 0 : i32
    %c0_i32_0 = arith.constant 0 : i32
    return %arg0, %arg1, %c0_i32 : i32, i32, i32
  }
  func.func @transform_1(%arg0: i32, %arg1: i32, %arg2: i32) -> (i32, i32) {
    %c0_i32 = arith.constant 0 : i32
    %c0_i32_0 = arith.constant 0 : i32
    return %c0_i32, %arg2 : i32, i32
  }
  func.func @transform_2(%arg0: i32, %arg1: i32, %arg2: i32) -> (i32, i32) {
    %c0_i32 = arith.constant 0 : i32
    %c0_i32_0 = arith.constant 0 : i32
    return %c0_i32, %arg2 : i32, i32
  }
  func.func @transform_3(%arg0: i32, %arg1: i32, %arg2: i32) -> (i32, i32, i32) {
    %c0_i32 = arith.constant 0 : i32
    return %arg0, %arg1, %arg2 : i32, i32, i32
  }
}

</mosaic_0001>

<bundles_post_ra>
// kernel: tpu_custom_call.1
= control target key start
LH: loop header
LB: loop body
LE: loop exit
PB: predicated region body
PF: predicated region fallthrough
CT: control target
= control target key end

     0   :  { %8 = vsyncpa [#allocation3], 0  ;;  %s944_s0 = inlined_call_operand.hbm [shape: bf16[2,8,32], index: 0, kind: input, shape index: {}]   ;;  %s945_s1 = inlined_call_operand.hbm [shape: bf16[32,32], index: 1, kind: input, shape index: {}]   ;;  %s946_s2 = inlined_call_operand.vmem [shape: f32[1,32], index: 2, kind: input, shape index: {}]   ;;  %s947_s3 = inlined_call_operand.hbm [shape: bf16[2,8,32], index: 3, kind: output, shape index: {}]  }
   0x1   :  { %10 = vsyncpa [#allocation3 + $0x1], 0 }
   0x2   :  { %11 = vsyncpa [#allocation6], 0 }
   0x3   :  { %12 = vsyncpa [#allocation4], 0 }
   0x4   :  { %14 = vsyncpa [#allocation4 + $0x1], 0  ;;  %s727_s12 = smov 0   ;;  %s729_s13 = smov 0  }
   0x5   :  { %s731_s14 = smov 0   ;;  %s733_s15 = smov 0  }
   0x6   :  { %s735_s16 = smov 0   ;;  %s737_s17 = smov 0  }
   0x7 LB: > { %s444_s18 = sadd.s32 4294967295, %s698_s17   ;;  %s445_s19 = sadd.s32 4294967294, %s698_s17   ;;  %s698_s17 = sphi %s737_s17, %s20_s17   ;;  %s694_s16 = sphi %s735_s16, %s971_s16   ;;  %s690_s15 = sphi %s733_s15, %s970_s15   ;;  %s686_s14 = sphi %s731_s14, %s969_s14   ;;  %s682_s13 = sphi %s729_s13, %s968_s13   ;;  %s678_s12 = sphi %s727_s12, %s967_s12  }
   0x8   : > { %p61_p0 = scmp.ne.s32.totalorder %s682_s13, %s678_s12  ;;  %p761_p1 = scmp.eq.s32.totalorder %s444_s18, 0 }
   0x9   : > { %p765_p2 = scmp.eq.s32.totalorder %s444_s18, 1  ;;  %p147_p3 = scmp.eq.s32.totalorder %s445_s19, 1 }
   0xa   : > { %s952_s20 = scalar_select %p761_p1, 1, 0 }
   0xb   : > { %s953_s21 = scalar_select %p765_p2, 1, 0 }
   0xc   : > { %p771_p4 = por %p761_p1, %p61_p0  ;;  %p446_p5 = scmp.ge.s32.totalorder %s698_s17, 1 }
   0xd   : > { %p776_p6 = por %p147_p3, %p61_p0  ;;  %p154_p7 = scmp.lt.s32.totalorder %s698_s17, 3 }
   0xe   : > { %s954_s22 = scalar_select %p771_p4, 1, 0 }
   0xf   : > { %s955_s23 = scalar_select %p776_p6, 1, 0 }
  0x10   : > { %p781_p8 = pnand %p446_p5, %p154_p7  ;;  %s700_s25 = smov [#allocation5]  }
  0x11   : > { %s168_s26 = sshll.u32 %s700_s25, 4  ;;  %s39_s28 = sadd.s32 1, %s694_s16  ;;  %s169_s26 = int_to_ptr.vmem [resolvable:$true] %s168_s26 }
  0x12   : > { %s956_s24 = scalar_select %p781_p8, 1, 0 }
  0x13   : > { %p483_p9 = pneg %p781_p8  ;;  %s554_s4 = scalar_lea.hbm %s945_s1, 256 }
  0x14   : > { %p555_p12 = scmp.ne.s32.totalorder %s945_s1, %s554_s4  ;;  %p561_p5 = scmp.lt.u32.totalorder %s554_s4, %s945_s1 }
  0x15   : > { %p790_p11 = pnand %p483_p9, %p761_p1 }
  0x17   : > { %p556_p13 = pneg %p790_p11 }
  0x19   : > { %p557_p0 = pnand %p556_p13, %p555_p12 }
  0x1b   : > { %p558_p3 = pneg %p557_p0 }
  0x1d   : > { %p563_p7 = pnand %p561_p5, %p558_p3 }
  0x1f   : > { %566 = shalt.err (!%p563_p7)
}
  0x20   : > { %s567_s9 = scalar_lea.vmem %s169_s26, 256  ;;  %p575_p1 = scmp.lt.s32.totalorder %s169_s26, %s169_s26 }
  0x21   : > { %p568_p9 = scmp.ne.s32.totalorder %s169_s26, %s567_s9  ;;  %p576_p4 = scmp.lt.s32.totalorder %s567_s9, %s567_s9 }
  0x23   : > { %p570_p10 = pnand %p568_p9, %p556_p13  ;;  %p577_p8 = por %p576_p4, %p575_p1 }
  0x25   : > { %p571_p6 = pneg %p570_p10 }
  0x27   : > { %p578_p2 = pnand %p577_p8, %p571_p6 }
  0x29   : > { %581 = shalt.err (!%p578_p2)
}
  0x2a   : > { %s701_s10 = smov 64   ;;  %s702_s11 = smov 4  }
  0x2b   : > { %486 = dma.hbm_to_vmem [thread:$0]  (!%p790_p11), %s945_s1, 256, %s169_s26, [#allocation6], %s701_s10, %s701_s10, %s702_s11  }
  0x2c   : > { %p41_p1 = scmp.ge.s32.totalorder %s39_s28, 2  ;;  %s48_s25 = sadd.s32 1, %s686_s14 }
  0x2d   : > { %p55_p2 = scmp.ne.s32.totalorder %s686_s14, %s682_s13  ;;  %p56_p4 = scmp.eq.s32.totalorder %s698_s17, 0 }
  0x2e   : > { %s973_s28 = smov (%p41_p1, %s39_s28), 0  ;;  %p959_p8 = scmp.ne.s32.totalorder %s953_s21, 0 }
  0x2f   : > { %p817_p6 = por %p56_p4, %p55_p2  ;;  %s43_s27 = ssub.s32 %s694_s16, %s973_s28 }
  0x30   : > { %p823_p10 = por %p959_p8, %p55_p2  ;;  %p496_p12 = scmp.lt.s32.totalorder %s698_s17, 2 }
  0x31   : > { %p46_p11 = scmp.eq.s32.totalorder %s43_s27, 0  ;;  %s188_s26 = sand.u32 1, %s686_s14  }
  0x32   : > { %s450_s4 = sshll.u32 %s188_s26, 2  ;;  %s451_s6 = sshll.u32 %s694_s16, 6 }
  0x33   : > { %s832_s5 = scalar_select %p46_p11, %s686_s14, %s48_s25  }
  0x34   : > { %s838_s9 = scalar_lea.hbm %s944_s0, %s451_s6  ;;  %s192_s21 = scalar_lea.vmem [#allocation2], %s450_s4 }
  0x35   : > { %s200_s10 = sshll.u32 %s192_s21, 4  ;;  %p844_p13 = pnand %p496_p12, %p817_p6  ;;  %s840_s10 = int_to_ptr.vmem [resolvable:$true] %s200_s10 }
  0x36   : > { %s189_s18 = scalar_lea.sflag [#allocation3], %s188_s26  ;;  %s582_s19 = scalar_lea.hbm %s838_s9, 64 }
  0x37   : > { %p583_p0 = scmp.ne.s32.totalorder %s838_s9, %s582_s19  ;;  %p584_p3 = pneg %p844_p13 }
  0x38   : > { %s587_s4 = scalar_lea.hbm %s944_s0, 128  ;;  %p588_p9 = scmp.lt.u32.totalorder %s838_s9, %s944_s0 }
  0x39   : > { %p585_p5 = pnand %p584_p3, %p583_p0  ;;  %p589_p1 = scmp.lt.u32.totalorder %s587_s4, %s582_s19 }
  0x3a   : > { %p591_p4 = scmp.lt.u32.totalorder %s582_s19, %s838_s9 }
  0x3b   : > { %p586_p7 = pneg %p585_p5  ;;  %p590_p2 = por %p589_p1, %p588_p9 }
  0x3d   : > { %p592_p6 = por %p591_p4, %p590_p2 }
  0x3f   : > { %p593_p8 = pnand %p592_p6, %p586_p7 }
  0x41   : > { %596 = shalt.err (!%p593_p8)
}
  0x42   : > { %s597_s26 = scalar_lea.vmem %s840_s10, 64  ;;  %s703_s7 = smov [#allocation2]  }
  0x43   : > { %p598_p12 = scmp.ne.s32.totalorder %s840_s10, %s597_s26  ;;  %s602_s8 = sshll.u32 %s703_s7, 4  ;;  %s603_s8 = int_to_ptr.vmem [resolvable:$false] %s602_s8 }
  0x44   : > { %s604_s21 = scalar_lea.vmem %s603_s8, 128  ;;  %p605_p5 = scmp.lt.s32.totalorder %s840_s10, %s603_s8 }
  0x45   : > { %p600_p11 = pnand %p598_p12, %p584_p3  ;;  %p606_p9 = scmp.lt.s32.totalorder %s604_s21, %s597_s26 }
  0x47   : > { %p601_p0 = pneg %p600_p11  ;;  %p607_p1 = por %p606_p9, %p605_p5 }
  0x49   : > { %p608_p2 = pnand %p607_p1, %p601_p0 }
  0x4b   : > { %611 = shalt.err (!%p608_p2)
}
  0x4c   : > { %490 = dma.hbm_to_vmem [thread:$0]  (!%p844_p13), %s838_s9, 64, %s840_s10, %s189_s18  }
  0x4d   : > { %p962_p7 = scmp.ne.s32.totalorder %s956_s24, 0 }
  0x4e   : > { %s876_s19 = sand.u32 (!%p962_p7), 1, %s682_s13   ;;  %p963_p3 = scmp.ne.s32.totalorder (!%p962_p7), %s954_s22, 0 }
  0x4f   : > { %209 = sbr.rel (%p962_p7) target bundleno = 329 (0x149), region = 32  ;;  %s453_s25 = sshll.u32 (!%p962_p7), %s876_s19, 2 }
  0x50   : > { %s212_s27 = scalar_lea.sflag (!%p962_p7), [#allocation3], %s876_s19  ;;  %s215_s4 = scalar_lea.vmem (!%p962_p7), [#allocation2], %s453_s25 }
  0x56   : > { %665 = dma.done.wait (%p963_p3), %s212_s27, 64  }
  0x57   : > { %667 = vsyncadd (%p963_p3), %s212_s27, 4294967232  ;;  %p964_p4 = scmp.ne.s32.totalorder %s952_s20, 0 }
  0x59   : > { %669 = dma.done.wait (%p964_p4), [#allocation6], 256  }
  0x5a   : > { %671 = vsyncadd (%p964_p4), [#allocation6], 4294967040  ;;  %v704_v0 = vmov 0.0   ;;  %vm705_vm0 = vmmov 0   ;;  %v552_v1 = vld [vmem:[#allocation5] sm:$0xff]   ;;  %v553_v2 = vld [vmem:[#allocation5 + $0x8] sm:$0xff]  }
  0x5b   : > { %467 = vmatprep.subr.bf16.mxu0 %v704_v0  ;;  %471 = vmatprep.mubr.msk.bf16.mxu0 %vm705_vm0, %v704_v0  ;;  %v249_v3 = vld [vmem:[%s215_s4] sm:$0xf]  ;;  %vm273_vm1 = vcmask 261120   ;;  %s461_s20 = sshll.u32 %s690_s15, 6  ;;  %s244_s9 = scalar_lea.vmem [#allocation7], %s453_s25  ;;  %vm318_vm2 = vcmask 257024  }
  0x5c   : > { %468 = vmatpush3.bf16.msra.mxu0 %v552_v1  ;;  %v456_v4 = vld [vmem:[%s946_s2] ss:$0 sm:$0xff]  ;;  %s336_s10 = sshll.u32 %s244_s9, 4  ;;  %s895_s29 = scalar_lea.hbm %s947_s3, %s461_s20  ;;  %s897_s10 = int_to_ptr.vmem [resolvable:$true] %s336_s10 }
  0x5d   : > { %469 = vmatprep.subr.bf16.mxu0 %v704_v0  ;;  %s321_s15 = scalar_lea.sflag [#allocation4], %s876_s19  ;;  %s612_s6 = scalar_lea.vmem %s897_s10, 64 }
  0x5e   : > { %p613_p13 = scmp.ne.s32.totalorder %s897_s10, %s612_s6  ;;  %s706_s26 = smov [#allocation7]  }
  0x5f   : > { %s616_s7 = sshll.u32 %s706_s26, 4  ;;  %s617_s7 = int_to_ptr.vmem [resolvable:$false] %s616_s7 }
  0x60   : > { %470 = vmatpush3.bf16.msra.mxu0 %v553_v2  ;;  %p614_p6 = pnand %p613_p13, %p823_p10  ;;  %s618_s8 = scalar_lea.vmem %s617_s7, 128 }
  0x61   : > { %p619_p12 = scmp.lt.s32.totalorder %s897_s10, %s617_s7  ;;  %p620_p11 = scmp.lt.s32.totalorder %s618_s8, %s612_s6 }
  0x62   : > { %p615_p8 = pneg %p614_p6 }
  0x63   : > { %472 = vmatmul.mubr.msk.bf16.vlgmr.msra.gmra.mrb[0].mxu0 %vm273_vm1, %v249_v3  ;;  %p621_p0 = por %p620_p11, %p619_p12 }
  0x65   : > { %p622_p5 = pnand %p621_p0, %p615_p8 }
 0x136   : > { %v311_v5 = vpop.f32.mrb[0].mxu0 }
 0x137   : > { %v312_v6 = vadd.f32 %v456_v4, %v311_v5  ;;  %v473_v7 = vpop.f32.mrb[1].mxu0 }
 0x138   : > { %v314_v8 = vpop.f32.mrb[2].mxu0 }
 0x139   : > { %v317_v9 = vpack.c.bf16 %v312_v6, %v312_v6  ;;  %v474_v10 = vpop.f32.mrb[3].mxu0 }
 0x13b   : > { %319 = vst.msk [vmem:[%s244_s9] sm:$0xf] %vm318_vm2, %v317_v9 }
 0x13c   : > { %625 = shalt.err (!%p622_p5)
}
 0x13d   : > { %s626_s21 = scalar_lea.hbm %s895_s29, 64  ;;  %s630_s27 = scalar_lea.hbm %s947_s3, 128 }
 0x13e   : > { %p627_p9 = scmp.ne.s32.totalorder %s895_s29, %s626_s21  ;;  %p631_p7 = scmp.lt.u32.totalorder %s895_s29, %s947_s3 }
 0x13f   : > { %p632_p3 = scmp.lt.u32.totalorder %s630_s27, %s626_s21  ;;  %p634_p13 = scmp.lt.u32.totalorder %s626_s21, %s895_s29 }
 0x140   : > { %p628_p1 = pnand %p627_p9, %p823_p10 }
 0x141   : > { %p633_p4 = por %p632_p3, %p631_p7 }
 0x142   : > { %p629_p2 = pneg %p628_p1 }
 0x143   : > { %p635_p6 = por %p634_p13, %p633_p4 }
 0x145   : > { %p636_p8 = pnand %p635_p6, %p629_p2 }
 0x147   : > { %639 = shalt.err (!%p636_p8)
}
 0x148   : > { %481 = dma.vmem_to_hbm [thread:$0]  (%p823_p10), %s897_s10, 64, %s895_s29, %s321_s15  }
 0x149 PF: > { %s348_s24 = sand.u32 1, %s678_s12   ;;  %p965_p12 = scmp.ne.s32.totalorder %s955_s23, 0 }
 0x14a   : > { %p966_p11 = scmp.ge.s32.totalorder %s698_s17, 2  ;;  %s349_s20 = scalar_lea.sflag [#allocation4], %s348_s24 }
 0x14c   : > { %p492_p0 = pnand %p966_p11, %p965_p12 }
 0x14e   : > { %673 = dma.done.wait (!%p492_p0), %s349_s20, 64  }
 0x14f   : > { %675 = vsyncadd (!%p492_p0), %s349_s20, 4294967232  ;;  %s20_s17 = sadd.s32 1, %s698_s17   ;;  %s967_s12 = smov %s682_s13 }
 0x150   : > { %p17_p5 = scmp.ge.s32.totalorder %s20_s17, 4   ;;  %s968_s13 = smov %s686_s14 }
 0x151   : > { %s969_s14 = smov %s832_s5  ;;  %s970_s15 = smov %s694_s16 }
 0x152   : > { %s971_s16 = smov %s973_s28  ;;  %19 = sbr.rel (!%p17_p5) target bundleno = 7 (0x7), region = 85 }
 0x159   :  { %354 = vsyncpa [#allocation3], 1 }
 0x15a   :  { %356 = vsyncpa [#allocation3 + $0x1], 1 }
 0x15b   :  { %357 = vsyncpa [#allocation6], 1 }
 0x15c   :  { %358 = vsyncpa [#allocation4], 1 }
 0x15d   :  { %360 = vsyncpa [#allocation4 + $0x1], 1 }

</bundles_post_ra>
